<compile_context>
chip_gen: v7x
topology: tpu7x:2x2x1
jax: 0.10.0
libtpu: 0.0.40
codegen_flags: <defaults>
</compile_context>

<pallas_src>
import jax
import jax.numpy as jnp
from jax.experimental import pallas as pl
from jax.experimental.pallas import tpu as pltpu

# ---------------- configuration (small, consistent with the module) ----------------
B = 2          # batch
S = 8          # sequence length
D = 32         # d_model
NHEAD = 4      # nhead
HD = D // NHEAD
F = 64         # dim_feedforward
EPS = 1e-5     # nn.LayerNorm default eps
BS = B * S


def _normalize(x):
    # Pure layernorm (no affine; gamma/beta folded into the next matmul in the wrapper).
    mu = jnp.mean(x, axis=-1, keepdims=True)
    xc = x - mu
    var = jnp.mean(xc * xc, axis=-1, keepdims=True)
    return xc * jax.lax.rsqrt(var + EPS)


def encoder_layer_kernel(
    x_ref,                        # (BS, D)
    in_wt_ref, in_b_ref,          # (D, 3D), (1, 3D)  (ln1 affine + q-scale folded in)
    out_wt_ref, out_b_ref,        # (D, D),  (1, D)
    fc1_wt_ref, fc1_b_ref,        # (D, F),  (1, F)   (ln2 affine folded in)
    fc2_wt_ref, fc2_b_ref,        # (F, D),  (1, D)
    o_ref,                        # (BS, D)
):
    x = x_ref[...]                                           # (BS, D)

    # ---- norm1 (pre-norm, affine folded into in_proj) ----
    xn = _normalize(x)

    # ---- multi-head self-attention (one fused QKV matmul, heads batched) ----
    qkv = jnp.dot(xn, in_wt_ref[...],
                  preferred_element_type=jnp.float32) + in_b_ref[...]    # (BS, 3D)
    q = qkv[:, 0 * D:1 * D]
    k = qkv[:, 1 * D:2 * D]
    v = qkv[:, 2 * D:3 * D]

    def split_heads(t):
        # (BS, D) -> (NHEAD*B, S, HD): head h / batch b lands at index h*B + b.
        t3 = t.reshape(B, S, D)
        return jnp.concatenate(
            [t3[:, :, h * HD:(h + 1) * HD] for h in range(NHEAD)], axis=0)

    qh = split_heads(q)        # already scaled by 1/sqrt(HD) via the folded weights
    kh = split_heads(k)
    vh = split_heads(v)

    s = jnp.einsum('nqd,nkd->nqk', qh, kh,
                   preferred_element_type=jnp.float32)        # (NHEAD*B, S, S)
    s = s - jnp.max(s, axis=-1, keepdims=True)
    p = jnp.exp(s)
    p = p * pl.reciprocal(jnp.sum(p, axis=-1, keepdims=True), approx=True)
    oh = jnp.einsum('nqk,nkd->nqd', p, vh,
                    preferred_element_type=jnp.float32)       # (NHEAD*B, S, HD)

    attn = jnp.concatenate(
        [oh[h * B:(h + 1) * B] for h in range(NHEAD)], axis=-1)    # (B, S, D)
    attn = attn.reshape(BS, D)
    attn = jnp.dot(attn, out_wt_ref[...],
                   preferred_element_type=jnp.float32) + out_b_ref[...]

    # ---- residual 1 (dropout == identity in eval) ----
    x1 = x + attn

    # ---- norm2 (affine folded into fc1) ----
    xn2 = _normalize(x1)

    # ---- feed-forward: fc1 -> relu -> fc2 ----
    h1 = jnp.dot(xn2, fc1_wt_ref[...],
                 preferred_element_type=jnp.float32) + fc1_b_ref[...]    # (BS, F)
    h1 = jnp.maximum(h1, 0.0)
    h2 = jnp.dot(h1, fc2_wt_ref[...],
                 preferred_element_type=jnp.float32) + fc2_b_ref[...]    # (BS, D)

    # ---- residual 2 ----
    o_ref[...] = x1 + h2


@jax.jit
def transformer_encoder_layer(x, params):
    (ln1_w, ln1_b, in_w, in_b, out_w, out_b,
     ln2_w, ln2_b, fc1_w, fc1_b, fc2_w, fc2_b) = params

    # One-time layout plumbing outside the kernel:
    #  * transpose weights to row-major matmul layout,
    #  * fold LN1 gamma/beta into the in_proj weight/bias,
    #  * fold the 1/sqrt(HD) attention scale into the q slice of in_proj,
    #  * fold LN2 gamma/beta into the fc1 weight/bias.
    scale = 1.0 / (HD ** 0.5)
    q_scale = jnp.concatenate(
        [jnp.full((1, D), scale, jnp.float32),
         jnp.ones((1, 2 * D), jnp.float32)], axis=-1)          # (1, 3D)

    in_wt = in_w.T                                             # (D, 3D)
    in_b_f = (ln1_b @ in_wt + in_b) * q_scale                  # (1, 3D)
    in_wt_f = in_wt * ln1_w.reshape(D, 1) * q_scale            # (D, 3D)

    out_wt = out_w.T                                           # (D, D)

    fc1_wt = fc1_w.T                                           # (D, F)
    fc1_b_f = ln2_b @ fc1_wt + fc1_b                           # (1, F)
    fc1_wt_f = fc1_wt * ln2_w.reshape(D, 1)                    # (D, F)

    fc2_wt = fc2_w.T                                           # (F, D)

    x2 = x.reshape(BS, D)

    vmem = pl.BlockSpec(memory_space=pltpu.MemorySpace.VMEM)
    out = pl.pallas_call(
        encoder_layer_kernel,
        out_shape=jax.ShapeDtypeStruct((BS, D), jnp.float32),
        in_specs=[vmem] * 9,
        out_specs=vmem,
    )(x2, in_wt_f, in_b_f, out_wt, out_b, fc1_wt_f, fc1_b_f, fc2_wt, fc2_b)
    return out.reshape(B, S, D)


# ---------------- pure-JAX reference (for a sanity check) ----------------
def reference(x, params):
    (ln1_w, ln1_b, in_w, in_b, out_w, out_b,
     ln2_w, ln2_b, fc1_w, fc1_b, fc2_w, fc2_b) = params

    def ln(v, w, b):
        mu = jnp.mean(v, -1, keepdims=True)
        var = jnp.mean((v - mu) ** 2, -1, keepdims=True)
        return (v - mu) / jnp.sqrt(var + EPS) * w + b

    xn = ln(x, ln1_w, ln1_b)                               # (B,S,D)
    qkv = jnp.einsum('bsd,ed->bse', xn, in_w) + in_b       # (B,S,3D)
    q, k, v = jnp.split(qkv, 3, axis=-1)

    def heads(t):
        return t.reshape(B, S, NHEAD, HD).transpose(0, 2, 1, 3)   # (B,H,S,HD)
    qh, kh, vh = heads(q), heads(k), heads(v)
    s = jnp.einsum('bhqd,bhkd->bhqk', qh, kh) / (HD ** 0.5)
    p = jax.nn.softmax(s, axis=-1)
    o = jnp.einsum('bhqk,bhkd->bhqd', p, vh).transpose(0, 2, 1, 3).reshape(B, S, D)
    attn = jnp.einsum('bsd,ed->bse', o, out_w) + out_b

    x1 = x + attn
    xn2 = ln(x1, ln2_w, ln2_b)
    h1 = jax.nn.relu(jnp.einsum('bsd,fd->bsf', xn2, fc1_w) + fc1_b)
    h2 = jnp.einsum('bsf,df->bsd', h1, fc2_w) + fc2_b
    return x1 + h2


def make_params(key):
    ks = jax.random.split(key, 12)
    scale = 0.1
    # Non-trivial LN affine so the gamma/beta folding is actually exercised.
    ln1_w = 1.0 + scale * jax.random.normal(ks[8], (1, D), jnp.float32)
    ln1_b = scale * jax.random.normal(ks[9], (1, D), jnp.float32)
    ln2_w = 1.0 + scale * jax.random.normal(ks[10], (1, D), jnp.float32)
    ln2_b = scale * jax.random.normal(ks[11], (1, D), jnp.float32)
    in_w = scale * jax.random.normal(ks[0], (3 * D, D), jnp.float32)
    in_b = scale * jax.random.normal(ks[1], (1, 3 * D), jnp.float32)
    out_w = scale * jax.random.normal(ks[2], (D, D), jnp.float32)
    out_b = scale * jax.random.normal(ks[3], (1, D), jnp.float32)
    fc1_w = scale * jax.random.normal(ks[4], (F, D), jnp.float32)
    fc1_b = scale * jax.random.normal(ks[5], (1, F), jnp.float32)
    fc2_w = scale * jax.random.normal(ks[6], (D, F), jnp.float32)
    fc2_b = scale * jax.random.normal(ks[7], (1, D), jnp.float32)
    return (ln1_w, ln1_b, in_w, in_b, out_w, out_b,
            ln2_w, ln2_b, fc1_w, fc1_b, fc2_w, fc2_b)


if __name__ == "__main__":
    key = jax.random.PRNGKey(0)
    kx, kp = jax.random.split(key)
    x = jax.random.normal(kx, (B, S, D), jnp.float32)
    params = make_params(kp)

    out = transformer_encoder_layer(x, params)
    out = jax.block_until_ready(out)

    ref = reference(x, params)
    assert out.shape == (B, S, D)
    assert jnp.allclose(out, ref, atol=2e-3, rtol=2e-3), (
        float(jnp.max(jnp.abs(out - ref))))
    print("KERNEL_OK")
</pallas_src>

<mosaic_0001>
module attributes {stable_mosaic.version = 11 : i64} {
  func.func @encoder_layer_kernel(%arg0: memref<16x32xf32, #tpu.memory_space<vmem>>, %arg1: memref<32x96xf32, #tpu.memory_space<vmem>>, %arg2: memref<1x96xf32, #tpu.memory_space<vmem>>, %arg3: memref<32x32xf32, #tpu.memory_space<vmem>>, %arg4: memref<1x32xf32, #tpu.memory_space<vmem>>, %arg5: memref<32x64xf32, #tpu.memory_space<vmem>>, %arg6: memref<1x64xf32, #tpu.memory_space<vmem>>, %arg7: memref<64x32xf32, #tpu.memory_space<vmem>>, %arg8: memref<1x32xf32, #tpu.memory_space<vmem>>, %arg9: memref<16x32xf32, #tpu.memory_space<vmem>>) attributes {dimension_semantics = [], scalar_prefetch = 0 : i64, scratch_operands = 0 : i64, tpu.core_type = #tpu.core_type<tc>} {
    %c0 = arith.constant 0 : index
    %c0_0 = arith.constant 0 : index
    %0 = vector.load %arg0[%c0, %c0_0] : memref<16x32xf32, #tpu.memory_space<vmem>>, vector<16x32xf32>
    %cst = arith.constant dense<0.000000e+00> : vector<16xf32>
    %1 = vector.multi_reduction <add>, %0, %cst [1] : vector<16x32xf32> to vector<16xf32>
    %2 = vector.shape_cast %1 : vector<16xf32> to vector<16x1xf32>
    %cst_1 = arith.constant 3.200000e+01 : f32
    %3 = vector.broadcast %cst_1 : f32 to vector<16x1xf32>
    %4 = arith.divf %2, %3 : vector<16x1xf32>
    %5 = vector.broadcast %4 : vector<16x1xf32> to vector<16x32xf32>
    %6 = arith.subf %0, %5 : vector<16x32xf32>
    %7 = arith.mulf %6, %6 : vector<16x32xf32>
    %cst_2 = arith.constant dense<0.000000e+00> : vector<16xf32>
    %8 = vector.multi_reduction <add>, %7, %cst_2 [1] : vector<16x32xf32> to vector<16xf32>
    %9 = vector.shape_cast %8 : vector<16xf32> to vector<16x1xf32>
    %cst_3 = arith.constant 3.200000e+01 : f32
    %10 = vector.broadcast %cst_3 : f32 to vector<16x1xf32>
    %11 = arith.divf %9, %10 : vector<16x1xf32>
    %cst_4 = arith.constant 9.99999974E-6 : f32
    %12 = vector.broadcast %cst_4 : f32 to vector<16x1xf32>
    %13 = arith.addf %11, %12 : vector<16x1xf32>
    %14 = math.rsqrt %13 : vector<16x1xf32>
    %15 = vector.broadcast %14 : vector<16x1xf32> to vector<16x32xf32>
    %16 = arith.mulf %6, %15 : vector<16x32xf32>
    %c0_5 = arith.constant 0 : index
    %c0_6 = arith.constant 0 : index
    %17 = vector.load %arg1[%c0_5, %c0_6] : memref<32x96xf32, #tpu.memory_space<vmem>>, vector<32x96xf32>
    %cst_7 = arith.constant dense<0.000000e+00> : vector<16x96xf32>
    %18 = tpu.matmul %16, %17, %cst_7 {dimension_numbers = #tpu.dot_dimension_numbers<[1], [0], [0], [1], [0, 0, 1, 1], [], []>} : vector<16x32xf32>, vector<32x96xf32>, vector<16x96xf32> -> vector<16x96xf32>
    %c0_8 = arith.constant 0 : index
    %c0_9 = arith.constant 0 : index
    %19 = vector.load %arg2[%c0_8, %c0_9] : memref<1x96xf32, #tpu.memory_space<vmem>>, vector<1x96xf32>
    %20 = vector.broadcast %19 : vector<1x96xf32> to vector<16x96xf32>
    %21 = arith.addf %18, %20 : vector<16x96xf32>
    %22 = vector.extract_strided_slice %21 {offsets = [0, 0], sizes = [16, 32], strides = [1, 1]} : vector<16x96xf32> to vector<16x32xf32>
    %23 = vector.extract_strided_slice %21 {offsets = [0, 32], sizes = [16, 32], strides = [1, 1]} : vector<16x96xf32> to vector<16x32xf32>
    %24 = vector.extract_strided_slice %21 {offsets = [0, 64], sizes = [16, 32], strides = [1, 1]} : vector<16x96xf32> to vector<16x32xf32>
    %25 = vector.shape_cast %22 : vector<16x32xf32> to vector<2x8x32xf32>
    %26 = vector.extract_strided_slice %25 {offsets = [0, 0, 0], sizes = [2, 8, 8], strides = [1, 1, 1]} : vector<2x8x32xf32> to vector<2x8x8xf32>
    %27 = vector.extract_strided_slice %25 {offsets = [0, 0, 8], sizes = [2, 8, 8], strides = [1, 1, 1]} : vector<2x8x32xf32> to vector<2x8x8xf32>
    %28 = vector.extract_strided_slice %25 {offsets = [0, 0, 16], sizes = [2, 8, 8], strides = [1, 1, 1]} : vector<2x8x32xf32> to vector<2x8x8xf32>
    %29 = vector.extract_strided_slice %25 {offsets = [0, 0, 24], sizes = [2, 8, 8], strides = [1, 1, 1]} : vector<2x8x32xf32> to vector<2x8x8xf32>
    %30 = tpu.concatenate %26, %27, %28, %29 in 0 : vector<2x8x8xf32>, vector<2x8x8xf32>, vector<2x8x8xf32>, vector<2x8x8xf32> -> vector<8x8x8xf32>
    %31 = vector.shape_cast %23 : vector<16x32xf32> to vector<2x8x32xf32>
    %32 = vector.extract_strided_slice %31 {offsets = [0, 0, 0], sizes = [2, 8, 8], strides = [1, 1, 1]} : vector<2x8x32xf32> to vector<2x8x8xf32>
    %33 = vector.extract_strided_slice %31 {offsets = [0, 0, 8], sizes = [2, 8, 8], strides = [1, 1, 1]} : vector<2x8x32xf32> to vector<2x8x8xf32>
    %34 = vector.extract_strided_slice %31 {offsets = [0, 0, 16], sizes = [2, 8, 8], strides = [1, 1, 1]} : vector<2x8x32xf32> to vector<2x8x8xf32>
    %35 = vector.extract_strided_slice %31 {offsets = [0, 0, 24], sizes = [2, 8, 8], strides = [1, 1, 1]} : vector<2x8x32xf32> to vector<2x8x8xf32>
    %36 = tpu.concatenate %32, %33, %34, %35 in 0 : vector<2x8x8xf32>, vector<2x8x8xf32>, vector<2x8x8xf32>, vector<2x8x8xf32> -> vector<8x8x8xf32>
    %37 = vector.shape_cast %24 : vector<16x32xf32> to vector<2x8x32xf32>
    %38 = vector.extract_strided_slice %37 {offsets = [0, 0, 0], sizes = [2, 8, 8], strides = [1, 1, 1]} : vector<2x8x32xf32> to vector<2x8x8xf32>
    %39 = vector.extract_strided_slice %37 {offsets = [0, 0, 8], sizes = [2, 8, 8], strides = [1, 1, 1]} : vector<2x8x32xf32> to vector<2x8x8xf32>
    %40 = vector.extract_strided_slice %37 {offsets = [0, 0, 16], sizes = [2, 8, 8], strides = [1, 1, 1]} : vector<2x8x32xf32> to vector<2x8x8xf32>
    %41 = vector.extract_strided_slice %37 {offsets = [0, 0, 24], sizes = [2, 8, 8], strides = [1, 1, 1]} : vector<2x8x32xf32> to vector<2x8x8xf32>
    %42 = tpu.concatenate %38, %39, %40, %41 in 0 : vector<2x8x8xf32>, vector<2x8x8xf32>, vector<2x8x8xf32>, vector<2x8x8xf32> -> vector<8x8x8xf32>
    "tpu.trace_start"() <{level = 10 : i32, message = "nqd,nkd->nqk"}> : () -> ()
    %cst_10 = arith.constant dense<0.000000e+00> : vector<8x8x8xf32>
    %43 = tpu.matmul %30, %36, %cst_10 {dimension_numbers = #tpu.dot_dimension_numbers<[2], [2], [1], [1], [0, 0, 0, 1, 1, 1], [0], [0]>} : vector<8x8x8xf32>, vector<8x8x8xf32>, vector<8x8x8xf32> -> vector<8x8x8xf32>
    "tpu.trace_stop"() : () -> ()
    %cst_11 = arith.constant dense<0xFF800000> : vector<8x8xf32>
    %44 = vector.multi_reduction <maximumf>, %43, %cst_11 [2] : vector<8x8x8xf32> to vector<8x8xf32>
    %45 = vector.shape_cast %44 : vector<8x8xf32> to vector<8x8x1xf32>
    %46 = vector.broadcast %45 : vector<8x8x1xf32> to vector<8x8x8xf32>
    %47 = arith.subf %43, %46 : vector<8x8x8xf32>
    %48 = math.exp %47 : vector<8x8x8xf32>
    %cst_12 = arith.constant dense<0.000000e+00> : vector<8x8xf32>
    %49 = vector.multi_reduction <add>, %48, %cst_12 [2] : vector<8x8x8xf32> to vector<8x8xf32>
    %50 = vector.shape_cast %49 : vector<8x8xf32> to vector<8x8x1xf32>
    %51 = tpu.reciprocal %50 {approx = true} : vector<8x8x1xf32> -> vector<8x8x1xf32>
    %52 = vector.broadcast %51 : vector<8x8x1xf32> to vector<8x8x8xf32>
    %53 = arith.mulf %48, %52 : vector<8x8x8xf32>
    "tpu.trace_start"() <{level = 10 : i32, message = "nqk,nkd->nqd"}> : () -> ()
    %cst_13 = arith.constant dense<0.000000e+00> : vector<8x8x8xf32>
    %54 = tpu.matmul %53, %42, %cst_13 {dimension_numbers = #tpu.dot_dimension_numbers<[2], [1], [1], [2], [0, 0, 0, 1, 1, 2], [0], [0]>} : vector<8x8x8xf32>, vector<8x8x8xf32>, vector<8x8x8xf32> -> vector<8x8x8xf32>
    "tpu.trace_stop"() : () -> ()
    %55 = vector.extract_strided_slice %54 {offsets = [0, 0, 0], sizes = [2, 8, 8], strides = [1, 1, 1]} : vector<8x8x8xf32> to vector<2x8x8xf32>
    %56 = vector.extract_strided_slice %54 {offsets = [2, 0, 0], sizes = [2, 8, 8], strides = [1, 1, 1]} : vector<8x8x8xf32> to vector<2x8x8xf32>
    %57 = vector.extract_strided_slice %54 {offsets = [4, 0, 0], sizes = [2, 8, 8], strides = [1, 1, 1]} : vector<8x8x8xf32> to vector<2x8x8xf32>
    %58 = vector.extract_strided_slice %54 {offsets = [6, 0, 0], sizes = [2, 8, 8], strides = [1, 1, 1]} : vector<8x8x8xf32> to vector<2x8x8xf32>
    %59 = tpu.concatenate %55, %56, %57, %58 in 2 : vector<2x8x8xf32>, vector<2x8x8xf32>, vector<2x8x8xf32>, vector<2x8x8xf32> -> vector<2x8x32xf32>
    %60 = vector.shape_cast %59 : vector<2x8x32xf32> to vector<16x32xf32>
    %c0_14 = arith.constant 0 : index
    %c0_15 = arith.constant 0 : index
    %61 = vector.load %arg3[%c0_14, %c0_15] : memref<32x32xf32, #tpu.memory_space<vmem>>, vector<32x32xf32>
    %cst_16 = arith.constant dense<0.000000e+00> : vector<16x32xf32>
    %62 = tpu.matmul %60, %61, %cst_16 {dimension_numbers = #tpu.dot_dimension_numbers<[1], [0], [0], [1], [0, 0, 1, 1], [], []>} : vector<16x32xf32>, vector<32x32xf32>, vector<16x32xf32> -> vector<16x32xf32>
    %c0_17 = arith.constant 0 : index
    %c0_18 = arith.constant 0 : index
    %63 = vector.load %arg4[%c0_17, %c0_18] : memref<1x32xf32, #tpu.memory_space<vmem>>, vector<1x32xf32>
    %64 = vector.broadcast %63 : vector<1x32xf32> to vector<16x32xf32>
    %65 = arith.addf %62, %64 : vector<16x32xf32>
    %66 = arith.addf %0, %65 : vector<16x32xf32>
    %cst_19 = arith.constant dense<0.000000e+00> : vector<16xf32>
    %67 = vector.multi_reduction <add>, %66, %cst_19 [1] : vector<16x32xf32> to vector<16xf32>
    %68 = vector.shape_cast %67 : vector<16xf32> to vector<16x1xf32>
    %cst_20 = arith.constant 3.200000e+01 : f32
    %69 = vector.broadcast %cst_20 : f32 to vector<16x1xf32>
    %70 = arith.divf %68, %69 : vector<16x1xf32>
    %71 = vector.broadcast %70 : vector<16x1xf32> to vector<16x32xf32>
    %72 = arith.subf %66, %71 : vector<16x32xf32>
    %73 = arith.mulf %72, %72 : vector<16x32xf32>
    %cst_21 = arith.constant dense<0.000000e+00> : vector<16xf32>
    %74 = vector.multi_reduction <add>, %73, %cst_21 [1] : vector<16x32xf32> to vector<16xf32>
    %75 = vector.shape_cast %74 : vector<16xf32> to vector<16x1xf32>
    %cst_22 = arith.constant 3.200000e+01 : f32
    %76 = vector.broadcast %cst_22 : f32 to vector<16x1xf32>
    %77 = arith.divf %75, %76 : vector<16x1xf32>
    %cst_23 = arith.constant 9.99999974E-6 : f32
    %78 = vector.broadcast %cst_23 : f32 to vector<16x1xf32>
    %79 = arith.addf %77, %78 : vector<16x1xf32>
    %80 = math.rsqrt %79 : vector<16x1xf32>
    %81 = vector.broadcast %80 : vector<16x1xf32> to vector<16x32xf32>
    %82 = arith.mulf %72, %81 : vector<16x32xf32>
    %c0_24 = arith.constant 0 : index
    %c0_25 = arith.constant 0 : index
    %83 = vector.load %arg5[%c0_24, %c0_25] : memref<32x64xf32, #tpu.memory_space<vmem>>, vector<32x64xf32>
    %cst_26 = arith.constant dense<0.000000e+00> : vector<16x64xf32>
    %84 = tpu.matmul %82, %83, %cst_26 {dimension_numbers = #tpu.dot_dimension_numbers<[1], [0], [0], [1], [0, 0, 1, 1], [], []>} : vector<16x32xf32>, vector<32x64xf32>, vector<16x64xf32> -> vector<16x64xf32>
    %c0_27 = arith.constant 0 : index
    %c0_28 = arith.constant 0 : index
    %85 = vector.load %arg6[%c0_27, %c0_28] : memref<1x64xf32, #tpu.memory_space<vmem>>, vector<1x64xf32>
    %86 = vector.broadcast %85 : vector<1x64xf32> to vector<16x64xf32>
    %87 = arith.addf %84, %86 : vector<16x64xf32>
    %cst_29 = arith.constant 0.000000e+00 : f32
    %88 = vector.broadcast %cst_29 : f32 to vector<16x64xf32>
    %89 = arith.maximumf %87, %88 : vector<16x64xf32>
    %c0_30 = arith.constant 0 : index
    %c0_31 = arith.constant 0 : index
    %90 = vector.load %arg7[%c0_30, %c0_31] : memref<64x32xf32, #tpu.memory_space<vmem>>, vector<64x32xf32>
    %cst_32 = arith.constant dense<0.000000e+00> : vector<16x32xf32>
    %91 = tpu.matmul %89, %90, %cst_32 {dimension_numbers = #tpu.dot_dimension_numbers<[1], [0], [0], [1], [0, 0, 1, 1], [], []>} : vector<16x64xf32>, vector<64x32xf32>, vector<16x32xf32> -> vector<16x32xf32>
    %c0_33 = arith.constant 0 : index
    %c0_34 = arith.constant 0 : index
    %92 = vector.load %arg8[%c0_33, %c0_34] : memref<1x32xf32, #tpu.memory_space<vmem>>, vector<1x32xf32>
    %93 = vector.broadcast %92 : vector<1x32xf32> to vector<16x32xf32>
    %94 = arith.addf %91, %93 : vector<16x32xf32>
    %95 = arith.addf %66, %94 : vector<16x32xf32>
    %c0_35 = arith.constant 0 : index
    %c0_36 = arith.constant 0 : index
    %96 = vector.load %arg9[%c0_35, %c0_36] : memref<16x32xf32, #tpu.memory_space<vmem>>, vector<16x32xf32>
    tpu.vector_store %arg9[%c0_35, %c0_36], %95 {strides = array<i32>} : memref<16x32xf32, #tpu.memory_space<vmem>>, vector<16x32xf32>,
    return
  }
}

</mosaic_0001>

<bundles_post_ra>
// kernel: transformer_encoder_layer.1
= control target key start
LH: loop header
LB: loop body
LE: loop exit
PB: predicated region body
PF: predicated region fallthrough
CT: control target
= control target key end

     0   :  { %vm35_vm0 = vcmask 261120   ;;  %s2532_s0 = inlined_call_operand.vmem [shape: f32[16,32], index: 0, kind: input, shape index: {}]   ;;  %s2533_s1 = inlined_call_operand.vmem [shape: f32[32,96], index: 1, kind: input, shape index: {}]   ;;  %s2534_s2 = inlined_call_operand.vmem [shape: f32[1,96], index: 2, kind: input, shape index: {}]   ;;  %s2535_s3 = inlined_call_operand.vmem [shape: f32[32,32], index: 3, kind: input, shape index: {}]   ;;  %s2536_s4 = inlined_call_operand.vmem [shape: f32[1,32], index: 4, kind: input, shape index: {}]   ;;  %s2537_s5 = inlined_call_operand.vmem [shape: f32[32,64], index: 5, kind: input, shape index: {}]   ;;  %s2538_s6 = inlined_call_operand.vmem [shape: f32[1,64], index: 6, kind: input, shape index: {}]   ;;  %s2539_s7 = inlined_call_operand.vmem [shape: f32[64,32], index: 7, kind: input, shape index: {}]   ;;  %s2540_s8 = inlined_call_operand.vmem [shape: f32[1,32], index: 8, kind: input, shape index: {}]   ;;  %s2541_s9 = inlined_call_operand.hbm [shape: f32[16,32], index: 9, kind: output, shape index: {}]  }
   0x1   :  { %v2246_v0 = vld [vmem:[%s2532_s0] sm:$0xff]  ;;  %v2251_v1 = vld [vmem:[%s2532_s0 + $0x8] sm:$0xff] }
   0x2   :  { %14 = vsyncpa [#allocation3], 0  ;;  %v36_v2 = vsel %vm35_vm0, %v2246_v0, 0.0  ;;  %v39_v3 = vsel %vm35_vm0, %v2251_v1, 0.0  ;;  %v63_v14 = vld [vmem:[%s2533_s1] sm:$0xff]  ;;  %v64_v15 = vld [vmem:[%s2533_s1 + $0x8] sm:$0xff] }
   0x3   :  { %37 = vadd.xlane.f32.xlu0 %v36_v2  ;;  %v65_v16 = vld [vmem:[%s2533_s1 + $0x10] sm:$0xff]  ;;  %v2065_v17 = vpack.c.bf16 %v64_v15, %v63_v14  ;;  %v66_v18 = vld [vmem:[%s2533_s1 + $0x18] sm:$0xff]  ;;  %v1837_v30 = vld [vmem:[%s2534_s2] ss:$0 sm:$0xff]  ;;  %v2181_v31 = vmov 0.0   ;;  %vm2182_vm1 = vmmov 0  }
   0x4   :  { %v2069_v19 = vpack.c.bf16 %v66_v18, %v65_v16  ;;  %1954 = vmatprep.subr.mxu0 %v2181_v31  ;;  %1956 = vmatprep.mubr.msk.f32.mxu0 %vm2182_vm1, %v2181_v31  ;;  %s2183_s21 = smov 120   ;;  %s2184_s2 = smov 112   ;;  %vm171_vm2 = vcmask 64512   ;;  %vm1500_vm3 = vcmask 130048   ;;  %vm1503_vm4 = vcmask 195584  }
   0x5   :  { %2066 = vmatprep.subr.bf16.mxu1 %v2065_v17  ;;  %s2185_s22 = smov 104   ;;  %s2186_s23 = smov 96   ;;  %vm1735_vm5 = vcmask 523264  }
   0x6   :  { %2068 = vmatpush3.bf16.msra.mxu1 %v2065_v17  ;;  %s2187_s24 = smov 64   ;;  %s2188_s12 = smov 8  }
   0x7   :  { %40 = vadd.xlane.f32.xlu0 %v39_v3  ;;  %2070 = vmatprep.subr.bf16.mxu1 %v2069_v19  ;;  %s2189_s0 = smov 16  }
   0xa   :  { %2072 = vmatpush3.bf16.msra.mxu1 %v2069_v19 }
   0xb   :  { %1944 = vmatprep.subr.mxu1 %v2181_v31 }
  0x90   :  { %v38_v4 = vpop.xlane.xlu0 %37 }
  0x91   :  { %v43_v5 = vmul.f32 0.03125, %v38_v4 }
  0x93   :  { %v45_v6 = vsub.f32 %v2246_v0, %v43_v5 }
  0x94   :  { %v41_v7 = vpop.xlane.xlu0 %40 }
  0x95   :  { %v44_v8 = vmul.f32 0.03125, %v41_v7  ;;  %v47_v9 = vmul.f32 %v45_v6, %v45_v6 }
  0x97   :  { %v46_v10 = vsub.f32 %v2251_v1, %v44_v8  ;;  %v49_v11 = vsel %vm35_vm0, %v47_v9, 0.0 }
  0x98   :  { %50 = vadd.xlane.f32.xlu1 %v49_v11 }
  0x99   :  { %v48_v12 = vmul.f32 %v46_v10, %v46_v10 }
  0x9b   :  { %v52_v13 = vsel %vm35_vm0, %v48_v12, 0.0 }
  0x9c   :  { %53 = vadd.xlane.f32.xlu1 %v52_v13 }
 0x125   :  { %v51_v20 = vpop.xlane.xlu1 %50 }
 0x126   :  { %v55_v21 = vmul.f32 0.03125, %v51_v20 }
 0x128   :  { %v57_v22 = vadd.f32 1e-05, %v55_v21 }
 0x129   :  { %v54_v23 = vpop.xlane.xlu1 %53 }
 0x12a   :  { %2117 = vrsqrt.f32 %v57_v22  ;;  %v56_v24 = vmul.f32 0.03125, %v54_v23 }
 0x12c   :  { %v58_v25 = vadd.f32 1e-05, %v56_v24 }
 0x12e   :  { %2119 = vrsqrt.f32 %v58_v25 }
 0x134   :  { %v2118_v26 = vpop.eup %2117 }
 0x135   :  { %v61_v27 = vmul.f32 %v2118_v26, %v45_v6 }
 0x137   :  { %1941 = vmatprep.mubr.msk.f32.mxu1 %vm35_vm0, %v61_v27 }
 0x138   :  { %v2120_v28 = vpop.eup %2119 }
 0x139   :  { %v62_v29 = vmul.f32 %v2120_v28, %v46_v10 }
 0x13b   :  { %1942 = vmatmul.mubr.msk.f32.vlgmr.msra.gmra.mrb[0].mxu1 %vm35_vm0, %v62_v29 }
 0x13c   :  { %1946 = vmatprep.mubr.msk.f32.mxu1 %vm2182_vm1, %v2181_v31 }
 0x20e   :  { %v1943_v32 = vpop.f32.mrb[0].mxu1 }
 0x20f   :  { %v2284_v33 = vadd.f32 %v1943_v32, %v1837_v30  ;;  %v146_v34 = vpop.f32.mrb[1].mxu1 }
 0x210   :  { %v2286_v35 = vadd.f32 %v1837_v30, %v146_v34 }
 0x211   :  { %159 = vrot.lane.b32.xlu1 %v2284_v33, %s2183_s21 }
 0x212   :  { %157 = vrot.lane.b32.xlu0 %v2286_v35, %s2183_s21 }
 0x215   :  { %161 = vrot.lane.b32.xlu1 %v2286_v35, %s2184_s2 }
 0x216   :  { %165 = vrot.lane.b32.xlu0 %v2286_v35, %s2185_s22 }
 0x219   :  { %163 = vrot.lane.b32.xlu1 %v2284_v33, %s2184_s2 }
 0x21a   :  { %169 = vrot.lane.b32.xlu0 %v2286_v35, %s2186_s23 }
 0x21d   :  { %167 = vrot.lane.b32.xlu1 %v2284_v33, %s2185_s22 }
 0x221   :  { %246 = vrot.lane.b32.xlu1 %v2284_v33, %s2186_s23 }
 0x283   :  { %v2296_v36 = vpop.permute.xlu1 %159 }
 0x284   :  { %398 = vrot.lane.b32.xlu1 %v2296_v36, %s2186_s23  ;;  %v2299_v37 = vpop.permute.xlu0 %157 }
 0x285   :  { %322 = vrot.lane.b32.xlu0 %v2299_v37, %s2186_s23 }
 0x287   :  { %v2302_v38 = vpop.permute.xlu1 %161 }
 0x288   :  { %v2304_v39 = vpop.permute.xlu0 %165 }
 0x289   :  { %474 = vrot.lane.b32.xlu0 %v2302_v38, %s2186_s23 }
 0x28b   :  { %v2307_v40 = vpop.permute.xlu1 %163 }
 0x28c   :  { %550 = vrot.lane.b32.xlu1 %v2307_v40, %s2186_s23  ;;  %v170_v41 = vpop.permute.xlu0 %169 }
 0x28d   :  { %626 = vrot.lane.b32.xlu0 %v2304_v39, %s2186_s23  ;;  %1945 = vmatpush3.xpose.msk.msra.mxu1 %vm171_vm2, %v170_v41 }
 0x28e   :  { %1949 = vmatprep.subr.mxu1 %v2181_v31 }
 0x28f   :  { %v2313_v42 = vpop.permute.xlu1 %167 }
 0x290   :  { %702 = vrot.lane.b32.xlu1 %v2313_v42, %s2186_s23  ;;  %1947 = vmatmul.mubr.msk.f32.vlgmr.msra.gmra.mrb[2].mxu1 %vm171_vm2, %v2286_v35 }
 0x291   :  { %1951 = vmatprep.mubr.msk.f32.mxu1 %vm2182_vm1, %v2181_v31 }
 0x293   :  { %v247_v43 = vpop.permute.xlu1 %246 }
 0x294   :  { %1950 = vmatpush3.xpose.msk.msra.mxu1 %vm171_vm2, %v247_v43 }
 0x295   :  { %1959 = vmatprep.subr.mxu1 %v2181_v31 }
 0x297   :  { %1952 = vmatmul.mubr.msk.f32.vlgmr.msra.gmra.mrb[4].mxu1 %vm171_vm2, %v2284_v33 }
 0x298   :  { %1961 = vmatprep.mubr.msk.f32.mxu1 %vm2182_vm1, %v2181_v31 }
 0x2f6   :  { %v399_v44 = vpop.permute.xlu1 %398 }
 0x2f7   :  { %1960 = vmatpush3.xpose.msk.msra.mxu1 %vm171_vm2, %v399_v44  ;;  %v323_v45 = vpop.permute.xlu0 %322 }
 0x2f8   :  { %1955 = vmatpush3.xpose.msk.msra.mxu0 %vm171_vm2, %v323_v45  ;;  %1969 = vmatprep.subr.mxu1 %v2181_v31 }
 0x2f9   :  { %1964 = vmatprep.subr.mxu0 %v2181_v31 }
 0x2fa   :  { %1962 = vmatmul.mubr.msk.f32.vlgmr.msra.gmra.mrb[6].mxu1 %vm171_vm2, %v2296_v36 }
 0x2fb   :  { %1957 = vmatmul.mubr.msk.f32.vlgmr.msra.gmra.mrb[0].mxu0 %vm171_vm2, %v2299_v37  ;;  %v475_v46 = vpop.permute.xlu0 %474  ;;  %1971 = vmatprep.mubr.msk.f32.mxu1 %vm2182_vm1, %v2181_v31 }
 0x2fc   :  { %1965 = vmatpush3.xpose.msk.msra.mxu0 %vm171_vm2, %v475_v46  ;;  %1966 = vmatprep.mubr.msk.f32.mxu0 %vm2182_vm1, %v2181_v31 }
 0x2fd   :  { %1974 = vmatprep.subr.mxu0 %v2181_v31 }
 0x2fe   :  { %v551_v47 = vpop.permute.xlu1 %550 }
 0x2ff   :  { %1967 = vmatmul.mubr.msk.f32.vlgmr.msra.gmra.mrb[2].mxu0 %vm171_vm2, %v2302_v38  ;;  %1970 = vmatpush3.xpose.msk.msra.mxu1 %vm171_vm2, %v551_v47  ;;  %v627_v48 = vpop.permute.xlu0 %626 }
 0x300   :  { %1975 = vmatpush3.xpose.msk.msra.mxu0 %vm171_vm2, %v627_v48  ;;  %1976 = vmatprep.mubr.msk.f32.mxu0 %vm2182_vm1, %v2181_v31 }
 0x301   :  { %1979 = vmatprep.subr.mxu1 %v2181_v31  ;;  %1984 = vmatprep.subr.mxu0 %v2181_v31 }
 0x302   :  { %v703_v49 = vpop.permute.xlu1 %702  ;;  %1972 = vmatmul.mubr.msk.f32.vlgmr.msra.gmra.mrb[8].mxu1 %vm171_vm2, %v2307_v40 }
 0x303   :  { %1977 = vmatmul.mubr.msk.f32.vlgmr.msra.gmra.mrb[4].mxu0 %vm171_vm2, %v2304_v39  ;;  %1980 = vmatpush3.xpose.msk.msra.mxu1 %vm171_vm2, %v703_v49 }
 0x304   :  { %1981 = vmatprep.mubr.msk.f32.mxu1 %vm2182_vm1, %v2181_v31  ;;  %1989 = vmatprep.subr.mxu1 %v2181_v31 }
 0x305   :  { %1986 = vmatprep.mubr.msk.f32.mxu0 %vm2182_vm1, %v2181_v31 }
 0x306   :  { %1982 = vmatmul.mubr.msk.f32.vlgmr.msra.gmra.mrb[10].mxu1 %vm171_vm2, %v2313_v42 }
 0x307   :  { %1991 = vmatprep.mubr.msk.f32.mxu1 %vm2182_vm1, %v2181_v31 }
 0x363   :  { %v242_v50 = vpop.f32.mrb[2].mxu1 }
 0x364   :  { %v1948_v51 = vpop.f32.mrb[3].mxu1  ;;  %v778_v52 = vsel %vm171_vm2, %v242_v50, -inf }
 0x365   :  { %779 = vmax.xlane.f32.xlu0 %v778_v52 }
 0x36a   :  { %v318_v53 = vpop.f32.mrb[4].mxu1 }
 0x36b   :  { %v1953_v54 = vpop.f32.mrb[5].mxu1  ;;  %v781_v55 = vsel %vm171_vm2, %v318_v53, -inf }
 0x36c   :  { %782 = vmax.xlane.f32.xlu1 %v781_v55 }
 0x3cd   :  { %v470_v56 = vpop.f32.mrb[6].mxu1 }
 0x3ce   :  { %v394_v57 = vpop.f32.mrb[0].mxu0  ;;  %v1963_v58 = vpop.f32.mrb[7].mxu1  ;;  %v787_v59 = vsel %vm171_vm2, %v470_v56, -inf }
 0x3cf   :  { %788 = vmax.xlane.f32.xlu0 %v787_v59  ;;  %v1958_v60 = vpop.f32.mrb[1].mxu0  ;;  %v784_v62 = vsel %vm171_vm2, %v394_v57, -inf }
 0x3d2   :  { %v546_v61 = vpop.f32.mrb[2].mxu0 }
 0x3d3   :  { %785 = vmax.xlane.f32.xlu0 %v784_v62  ;;  %v1968_v63 = vpop.f32.mrb[3].mxu0  ;;  %v790_v6 = vsel %vm171_vm2, %v546_v61, -inf }
 0x3d5   :  { %v622_v2 = vpop.f32.mrb[8].mxu1 }
 0x3d6   :  { %v1973_v3 = vpop.f32.mrb[9].mxu1  ;;  %v698_v4 = vpop.f32.mrb[4].mxu0  ;;  %v793_v5 = vsel %vm171_vm2, %v622_v2, -inf }
 0x3d7   :  { %794 = vmax.xlane.f32.xlu1 %v793_v5  ;;  %791 = vmax.xlane.f32.xlu0 %v790_v6  ;;  %v1978_v7 = vpop.f32.mrb[5].mxu0  ;;  %v796_v11 = vsel %vm171_vm2, %v698_v4, -inf }
 0x3d9   :  { %v774_v8 = vpop.f32.mrb[10].mxu1 }
 0x3da   :  { %v1983_v9 = vpop.f32.mrb[11].mxu1  ;;  %v799_v10 = vsel %vm171_vm2, %v774_v8, -inf }
 0x3db   :  { %800 = vmax.xlane.f32.xlu1 %v799_v10  ;;  %797 = vmax.xlane.f32.xlu0 %v796_v11 }
 0x3ec   :  { %942 = vrot.lane.b32.xlu1 %v2284_v33, %s2187_s24 }
 0x3f0   :  { %1018 = vrot.lane.b32.xlu1 %v2299_v37, %s2187_s24 }
 0x3f1   :  { %866 = vrot.lane.b32.xlu0 %v2286_v35, %s2187_s24 }
 0x3f2   :  { %v780_v12 = vpop.xlane.xlu0 %779 }
 0x3f3   :  { %v802_v13 = vsub.f32 %v242_v50, %v780_v12 }
 0x3f4   :  { %1094 = vrot.lane.b32.xlu1 %v2296_v36, %s2187_s24 }
 0x3f5   :  { %1170 = vrot.lane.b32.xlu0 %v2302_v38, %s2187_s24  ;;  %v810_v14 = vmul.f32 1.442695, %v802_v13 }
 0x3f7   :  { %2121 = vpow2.f32 %v810_v14 }
 0x3f8   :  { %1246 = vrot.lane.b32.xlu1 %v2307_v40, %s2187_s24 }
 0x3f9   :  { %v783_v15 = vpop.xlane.xlu1 %782 }
 0x3fa   :  { %v803_v16 = vsub.f32 %v318_v53, %v783_v15 }
 0x3fc   :  { %v812_v17 = vmul.f32 1.442695, %v803_v16 }
 0x3fe   :  { %2123 = vpow2.f32 %v812_v17 }
 0x401   :  { %v2382_v18 = vpop.eup %2121 }
 0x402   :  { %v826_v19 = vsel %vm171_vm2, %v2382_v18, 0.0 }
 0x408   :  { %v2386_v20 = vpop.eup %2123 }
 0x409   :  { %v829_v21 = vsel %vm171_vm2, %v2386_v20, 0.0 }
 0x414   :  { %827 = vadd.xlane.f32.xlu0 %v826_v19 }
 0x41c   :  { %830 = vadd.xlane.f32.xlu1 %v829_v21 }
 0x45c   :  { %v789_v22 = vpop.xlane.xlu0 %788 }
 0x45d   :  { %v805_v23 = vsub.f32 %v470_v56, %v789_v22 }
 0x45f   :  { %v816_v24 = vmul.f32 1.442695, %v805_v23 }
 0x460   :  { %v786_v25 = vpop.xlane.xlu0 %785 }
 0x461   :  { %2125 = vpow2.f32 %v816_v24  ;;  %v804_v26 = vsub.f32 %v394_v57, %v786_v25 }
 0x463   :  { %v814_v27 = vmul.f32 1.442695, %v804_v26 }
 0x464   :  { %v795_v28 = vpop.xlane.xlu1 %794  ;;  %v792_v29 = vpop.xlane.xlu0 %791 }
 0x465   :  { %2127 = vpow2.f32 %v814_v27  ;;  %v807_v30 = vsub.f32 %v622_v2, %v795_v28  ;;  %v806_v32 = vsub.f32 %v546_v61, %v792_v29  ;;  %v1506_v27 = vld [vmem:[%s2535_s3] sm:$0xff]  ;;  %v1507_v28 = vld [vmem:[%s2535_s3 + $0x8] sm:$0xff] }
 0x466   :  { %v2073_v29 = vpack.c.bf16 %v1507_v28, %v1506_v27 }
 0x467   :  { %v820_v33 = vmul.f32 1.442695, %v807_v30  ;;  %v818_v34 = vmul.f32 1.442695, %v806_v32  ;;  %v1509_v30 = vld [vmem:[%s2535_s3 + $0x18] sm:$0xff] }
 0x468   :  { %v801_v35 = vpop.xlane.xlu1 %800  ;;  %v798_v36 = vpop.xlane.xlu0 %797 }
 0x469   :  { %2129 = vpow2.f32 %v820_v33  ;;  %v809_v37 = vsub.f32 %v774_v8, %v801_v35  ;;  %v808_v38 = vsub.f32 %v698_v4, %v798_v36 }
 0x46a   :  { %2131 = vpow2.f32 %v818_v34 }
 0x46b   :  { %v2126_v40 = vpop.eup %2125  ;;  %v824_v41 = vmul.f32 1.442695, %v809_v37  ;;  %v822_v43 = vmul.f32 1.442695, %v808_v38 }
 0x46c   :  { %v943_v44 = vpop.permute.xlu1 %942  ;;  %v867_v45 = vpop.permute.xlu0 %866  ;;  %v835_v46 = vsel %vm171_vm2, %v2126_v40, 0.0 }
 0x46d   :  { %2133 = vpow2.f32 %v824_v41  ;;  %1990 = vmatpush3.msra.mxu1 %v943_v44  ;;  %836 = vadd.xlane.f32.xlu1 %v835_v46 }
 0x46e   :  { %2135 = vpow2.f32 %v822_v43  ;;  %1985 = vmatpush3.msra.mxu0 %v867_v45  ;;  %1999 = vmatprep.subr.mxu1 %v2181_v31 }
 0x46f   :  { %v2128_v47 = vpop.eup %2127  ;;  %1994 = vmatprep.subr.mxu0 %v2181_v31 }
 0x470   :  { %v832_v48 = vsel %vm171_vm2, %v2128_v47, 0.0  ;;  %v1019_v57 = vpop.permute.xlu1 %1018  ;;  %v1171_v58 = vpop.permute.xlu0 %1170 }
 0x471   :  { %833 = vadd.xlane.f32.xlu0 %v832_v48 }
 0x473   :  { %v2130_v49 = vpop.eup %2129 }
 0x474   :  { %v2132_v50 = vpop.eup %2131  ;;  %v841_v51 = vsel %vm171_vm2, %v2130_v49, 0.0  ;;  %v1095_v59 = vpop.permute.xlu1 %1094 }
 0x475   :  { %842 = vadd.xlane.f32.xlu1 %v841_v51  ;;  %v838_v52 = vsel %vm171_vm2, %v2132_v50, 0.0 }
 0x476   :  { %839 = vadd.xlane.f32.xlu0 %v838_v52 }
 0x477   :  { %v2396_v53 = vpop.eup %2133 }
 0x478   :  { %v2398_v54 = vpop.eup %2135  ;;  %v847_v55 = vsel %vm171_vm2, %v2396_v53, 0.0  ;;  %v1247_v61 = vpop.permute.xlu1 %1246 }
 0x479   :  { %848 = vadd.xlane.f32.xlu1 %v847_v55  ;;  %v844_v56 = vsel %vm171_vm2, %v2398_v54, 0.0 }
 0x47a   :  { %845 = vadd.xlane.f32.xlu0 %v844_v56 }
 0x48a   :  { %1398 = vrot.lane.b32.xlu1 %v2313_v42, %s2187_s24 }
 0x490   :  { %1322 = vrot.lane.b32.xlu0 %v2304_v39, %s2187_s24 }
 0x4a1   :  { %v828_v60 = vpop.xlane.xlu0 %827 }
 0x4a2   :  { %2137 = vrcp.f32 %v828_v60 }
 0x4a9   :  { %v831_v62 = vpop.xlane.xlu1 %830 }
 0x4aa   :  { %2139 = vrcp.f32 %v831_v62 }
 0x4ac   :  { %v2138_v63 = vpop.eup %2137 }
 0x4ad   :  { %v858_v2 = vmul.f32 %v2138_v63, %v2382_v18 }
 0x4af   :  { %1987 = vmatmul.mubr.msk.f32.vlgmr.msra.gmra.mrb[6].mxu0 %vm171_vm2, %v858_v2 }
 0x4b0   :  { %1995 = vmatpush3.msra.mxu0 %v1019_v57  ;;  %1996 = vmatprep.mubr.msk.f32.mxu0 %vm2182_vm1, %v2181_v31 }
 0x4b1   :  { %2004 = vmatprep.subr.mxu0 %v2181_v31 }
 0x4b4   :  { %v2140_v39 = vpop.eup %2139 }
 0x4b5   :  { %v859_v42 = vmul.f32 %v2140_v39, %v2386_v20 }
 0x4b7   :  { %1992 = vmatmul.mubr.msk.f32.vlgmr.msra.gmra.mrb[12].mxu1 %vm171_vm2, %v859_v42 }
 0x4b8   :  { %2000 = vmatpush3.msra.mxu1 %v1095_v59  ;;  %2001 = vmatprep.mubr.msk.f32.mxu1 %vm2182_vm1, %v2181_v31  ;;  %v1864_v59 = vld [vmem:[%s2536_s4] ss:$0 sm:$0xff] }
 0x4b9   :  { %2009 = vmatprep.subr.mxu1 %v2181_v31 }
 0x4fa   :  { %v837_v3 = vpop.xlane.xlu1 %836 }
 0x4fb   :  { %2141 = vrcp.f32 %v837_v3 }
 0x4fe   :  { %v834_v4 = vpop.xlane.xlu0 %833 }
 0x4ff   :  { %2143 = vrcp.f32 %v834_v4 }
 0x502   :  { %v843_v5 = vpop.xlane.xlu1 %842 }
 0x503   :  { %2145 = vrcp.f32 %v843_v5  ;;  %v840_v6 = vpop.xlane.xlu0 %839 }
 0x504   :  { %2147 = vrcp.f32 %v840_v6 }
 0x505   :  { %v2142_v7 = vpop.eup %2141 }
 0x506   :  { %v861_v8 = vmul.f32 %v2142_v7, %v2126_v40  ;;  %v849_v9 = vpop.xlane.xlu1 %848 }
 0x507   :  { %2149 = vrcp.f32 %v849_v9  ;;  %v846_v10 = vpop.xlane.xlu0 %845 }
 0x508   :  { %2151 = vrcp.f32 %v846_v10  ;;  %2002 = vmatmul.mubr.msk.f32.vlgmr.msra.gmra.mrb[14].mxu1 %vm171_vm2, %v861_v8 }
 0x509   :  { %v2144_v11 = vpop.eup %2143  ;;  %2010 = vmatpush3.msra.mxu1 %v1247_v61  ;;  %2011 = vmatprep.mubr.msk.f32.mxu1 %vm2182_vm1, %v2181_v31 }
 0x50a   :  { %v860_v12 = vmul.f32 %v2144_v11, %v2128_v47  ;;  %2019 = vmatprep.subr.mxu1 %v2181_v31  ;;  %v1399_v17 = vpop.permute.xlu1 %1398 }
 0x50b   :  { %v1323_v19 = vpop.permute.xlu0 %1322 }
 0x50c   :  { %1997 = vmatmul.mubr.msk.f32.vlgmr.msra.gmra.mrb[8].mxu0 %vm171_vm2, %v860_v12  ;;  %v1626_v12 = vld [vmem:[%s2537_s5] sm:$0xff] }
 0x50d   :  { %v2146_v13 = vpop.eup %2145  ;;  %2005 = vmatpush3.msra.mxu0 %v1171_v58  ;;  %2006 = vmatprep.mubr.msk.f32.mxu0 %vm2182_vm1, %v2181_v31 }
 0x50e   :  { %v2148_v14 = vpop.eup %2147  ;;  %v863_v15 = vmul.f32 %v2146_v13, %v2130_v49  ;;  %2014 = vmatprep.subr.mxu0 %v2181_v31  ;;  %v1627_v13 = vld [vmem:[%s2537_s5 + $0x8] sm:$0xff] }
 0x50f   :  { %v862_v16 = vmul.f32 %v2148_v14, %v2132_v50  ;;  %v2081_v14 = vpack.c.bf16 %v1627_v13, %v1626_v12 }
 0x510   :  { %2012 = vmatmul.mubr.msk.f32.vlgmr.msra.gmra.mrb[16].mxu1 %vm171_vm2, %v863_v15  ;;  %v1628_v15 = vld [vmem:[%s2537_s5 + $0x10] sm:$0xff] }
 0x511   :  { %v2150_v18 = vpop.eup %2149  ;;  %2007 = vmatmul.mubr.msk.f32.vlgmr.msra.gmra.mrb[10].mxu0 %vm171_vm2, %v862_v16  ;;  %2020 = vmatpush3.msra.mxu1 %v1399_v17  ;;  %v1629_v16 = vld [vmem:[%s2537_s5 + $0x18] sm:$0xff] }
 0x512   :  { %v2152_v20 = vpop.eup %2151  ;;  %v865_v21 = vmul.f32 %v2150_v18, %v2396_v53  ;;  %2015 = vmatpush3.msra.mxu0 %v1323_v19  ;;  %2016 = vmatprep.mubr.msk.f32.mxu0 %vm2182_vm1, %v2181_v31  ;;  %v2085_v17 = vpack.c.bf16 %v1629_v16, %v1628_v15  ;;  %v1720_v18 = vld [vmem:[%s2539_s7] sm:$0xff]  ;;  %v1721_v19 = vld [vmem:[%s2539_s7 + $0x8] sm:$0xff] }
 0x513   :  { %v864_v22 = vmul.f32 %v2152_v20, %v2398_v54  ;;  %2021 = vmatprep.mubr.msk.f32.mxu1 %vm2182_vm1, %v2181_v31  ;;  %2074 = vmatprep.subr.bf16.mxu0 %v2073_v29  ;;  %v1508_v31 = vld [vmem:[%s2535_s3 + $0x10] sm:$0xff]  ;;  %s2190_s3 = smov 24  }
 0x514   :  { %2022 = vmatmul.mubr.msk.f32.vlgmr.msra.gmra.mrb[18].mxu1 %vm171_vm2, %v865_v21  ;;  %v2077_v32 = vpack.c.bf16 %v1509_v30, %v1508_v31  ;;  %2082 = vmatprep.subr.bf16.mxu1 %v2081_v14  ;;  %v1722_v20 = vld [vmem:[%s2539_s7 + $0x10] sm:$0xff]  ;;  %v2089_v21 = vpack.c.bf16 %v1721_v19, %v1720_v18 }
 0x515   :  { %2017 = vmatmul.mubr.msk.f32.vlgmr.msra.gmra.mrb[12].mxu0 %vm171_vm2, %v864_v22  ;;  %2084 = vmatpush3.bf16.msra.mxu1 %v2081_v14  ;;  %v1723_v22 = vld [vmem:[%s2539_s7 + $0x18] sm:$0xff] }
 0x516   :  { %2076 = vmatpush3.bf16.msra.mxu0 %v2073_v29  ;;  %2086 = vmatprep.subr.bf16.mxu1 %v2085_v17 }
 0x517   :  { %2078 = vmatprep.subr.bf16.mxu0 %v2077_v32 }
 0x519   :  { %2088 = vmatpush3.bf16.msra.mxu1 %v2085_v17 }
 0x51a   :  { %2080 = vmatpush3.bf16.msra.mxu0 %v2077_v32 }
 0x51b   :  { %2090 = vmatprep.subr.bf16.mxu0 %v2089_v21 }
 0x582   :  { %v938_v23 = vpop.f32.mrb[6].mxu0 }
 0x583   :  { %v1988_v24 = vpop.f32.mrb[7].mxu0 }
 0x584   :  { %v1724_v24 = vld [vmem:[%s2539_s7 + $0x20] sm:$0xff] }
 0x58a   :  { %v1014_v25 = vpop.f32.mrb[12].mxu1 }
 0x58b   :  { %v1993_v26 = vpop.f32.mrb[13].mxu1 }
 0x5db   :  { %v1166_v33 = vpop.f32.mrb[14].mxu1 }
 0x5dc   :  { %1478 = vrot.lane.b32.xlu1 %v1166_v33, %s2188_s12  ;;  %v2003_v34 = vpop.f32.mrb[15].mxu1 }
 0x5df   :  { %v1090_v35 = vpop.f32.mrb[8].mxu0 }
 0x5e0   :  { %1476 = vrot.lane.b32.xlu0 %v1090_v35, %s2188_s12  ;;  %v1998_v36 = vpop.f32.mrb[9].mxu0 }
 0x5e3   :  { %v1318_v37 = vpop.f32.mrb[16].mxu1 }
 0x5e4   :  { %v1242_v38 = vpop.f32.mrb[10].mxu0  ;;  %1486 = vrot.lane.b32.xlu1 %v1318_v37, %s2189_s0  ;;  %v2013_v40 = vpop.f32.mrb[17].mxu1  ;;  %v1726_v37 = vld [vmem:[%s2539_s7 + $0x30] sm:$0xff] }
 0x5e5   :  { %1484 = vrot.lane.b32.xlu0 %v1242_v38, %s2189_s0  ;;  %v2008_v41 = vpop.f32.mrb[11].mxu0  ;;  %v1727_v38 = vld [vmem:[%s2539_s7 + $0x38] sm:$0xff] }
 0x5e6   :  { %v2101_v40 = vpack.c.bf16 %v1727_v38, %v1726_v37  ;;  %v1867_v41 = vld [vmem:[%s2538_s6] ss:$0 sm:$0xff] }
 0x5e7   :  { %v1470_v43 = vpop.f32.mrb[18].mxu1 }
 0x5e8   :  { %v1394_v44 = vpop.f32.mrb[12].mxu0  ;;  %1494 = vrot.lane.b32.xlu1 %v1470_v43, %s2190_s3  ;;  %v2023_v45 = vpop.f32.mrb[19].mxu1 }
 0x5e9   :  { %1492 = vrot.lane.b32.xlu0 %v1394_v44, %s2190_s3  ;;  %v2018_v46 = vpop.f32.mrb[13].mxu0 }
 0x64e   :  { %v1479_v47 = vpop.permute.xlu1 %1478 }
 0x64f   :  { %v1499_v51 = vsel %vm171_vm2, %v1014_v25, %v1479_v47  ;;  %v1725_v25 = vld [vmem:[%s2539_s7 + $0x28] sm:$0xff]  ;;  %s2191_s7 = smov [#allocation2]  }
 0x650   :  { %v2097_v26 = vpack.c.bf16 %v1725_v25, %v1724_v24  ;;  %s1826_s16 = sshll.u32 %s2191_s7, 4  ;;  %s1827_s16 = int_to_ptr.vmem [resolvable:$true] %s1826_s16 }
 0x651   :  { %s2157_s6 = scalar_lea.vmem %s1827_s16, 256  ;;  %p2162_p1 = scmp.lt.s32.totalorder %s1827_s16, %s1827_s16 }
 0x652   :  { %v1477_v48 = vpop.permute.xlu0 %1476  ;;  %p2158_p0 = scmp.ne.s32.totalorder %s1827_s16, %s2157_s6  ;;  %p2163_p2 = scmp.lt.s32.totalorder %s2157_s6, %s2157_s6 }
 0x653   :  { %v1498_v52 = vsel %vm171_vm2, %v938_v23, %v1477_v48  ;;  %v2093_v23 = vpack.c.bf16 %v1723_v22, %v1722_v20 }
 0x654   :  { %p2164_p3 = por %p2163_p2, %p2162_p1 }
 0x656   :  { %v1487_v49 = vpop.permute.xlu1 %1486  ;;  %p2165_p4 = pnand %p2164_p3, %p2158_p0 }
 0x657   :  { %v1485_v50 = vpop.permute.xlu0 %1484  ;;  %v1502_v53 = vsel %vm1500_vm3, %v1499_v51, %v1487_v49  ;;  %v1870_v49 = vld [vmem:[%s2540_s8] ss:$0 sm:$0xff] }
 0x658   :  { %v1501_v55 = vsel %vm1500_vm3, %v1498_v52, %v1485_v50 }
 0x65a   :  { %v1495_v54 = vpop.permute.xlu1 %1494 }
 0x65b   :  { %v1505_v56 = vsel %vm1503_vm4, %v1502_v53, %v1495_v54  ;;  %v1493_v57 = vpop.permute.xlu0 %1492 }
 0x65c   :  { %v1504_v58 = vsel %vm1503_vm4, %v1501_v55, %v1493_v57 }
 0x65d   :  { %2032 = vmatprep.mubr.msk.f32.mxu0 %vm35_vm0, %v1504_v58 }
 0x65e   :  { %2033 = vmatmul.mubr.msk.f32.vlgmr.msra.gmra.mrb[14].mxu0 %vm35_vm0, %v1505_v56 }
 0x65f   :  { %2092 = vmatpush3.bf16.msra.mxu0 %v2089_v21 }
 0x660   :  { %2094 = vmatprep.subr.bf16.mxu0 %v2093_v23 }
 0x663   :  { %2096 = vmatpush3.bf16.msra.mxu0 %v2093_v23 }
 0x664   :  { %2098 = vmatprep.subr.bf16.mxu0 %v2097_v26 }
 0x667   :  { %2100 = vmatpush3.bf16.msra.mxu0 %v2097_v26 }
 0x668   :  { %2102 = vmatprep.subr.bf16.mxu0 %v2101_v40 }
 0x66b   :  { %2104 = vmatpush3.bf16.msra.mxu0 %v2101_v40 }
 0x731   :  { %v2034_v60 = vpop.f32.mrb[14].mxu0 }
 0x732   :  { %v1595_v61 = vadd.f32 %v2034_v60, %v1864_v59  ;;  %v1589_v62 = vpop.f32.mrb[15].mxu0 }
 0x733   :  { %v1590_v63 = vadd.f32 %v1864_v59, %v1589_v62 }
 0x734   :  { %v2458_v2 = vadd.f32 %v1595_v61, %v2251_v1 }
 0x735   :  { %v2461_v39 = vadd.f32 %v1590_v63, %v2246_v0 }
 0x736   :  { %v1603_v42 = vsel %vm35_vm0, %v2458_v2, 0.0 }
 0x737   :  { %1604 = vadd.xlane.f32.xlu1 %v1603_v42  ;;  %v1600_v3 = vsel %vm35_vm0, %v2461_v39, 0.0 }
 0x738   :  { %1601 = vadd.xlane.f32.xlu0 %v1600_v3 }
 0x7c4   :  { %v1605_v4 = vpop.xlane.xlu1 %1604 }
 0x7c5   :  { %v1607_v5 = vmul.f32 0.03125, %v1605_v4  ;;  %v1602_v6 = vpop.xlane.xlu0 %1601 }
 0x7c6   :  { %v1606_v7 = vmul.f32 0.03125, %v1602_v6 }
 0x7c7   :  { %v1609_v8 = vsub.f32 %v2458_v2, %v1607_v5 }
 0x7c8   :  { %v1608_v1 = vsub.f32 %v2461_v39, %v1606_v7 }
 0x7c9   :  { %v1611_v10 = vmul.f32 %v1609_v8, %v1609_v8 }
 0x7ca   :  { %v1610_v9 = vmul.f32 %v1608_v1, %v1608_v1 }
 0x7cb   :  { %v1615_v11 = vsel %vm35_vm0, %v1611_v10, 0.0 }
 0x7cc   :  { %v1612_v0 = vsel %vm35_vm0, %v1610_v9, 0.0 }
 0x7cd   :  { %1613 = vadd.xlane.f32.xlu0 %v1612_v0 }
 0x7d1   :  { %1616 = vadd.xlane.f32.xlu0 %v1615_v11 }
 0x85a   :  { %v1614_v27 = vpop.xlane.xlu0 %1613 }
 0x85b   :  { %v1618_v28 = vmul.f32 0.03125, %v1614_v27 }
 0x85d   :  { %v1620_v29 = vadd.f32 1e-05, %v1618_v28 }
 0x85e   :  { %v1617_v31 = vpop.xlane.xlu0 %1616 }
 0x85f   :  { %2153 = vrsqrt.f32 %v1620_v29  ;;  %v1619_v30 = vmul.f32 0.03125, %v1617_v31 }
 0x861   :  { %v1621_v32 = vadd.f32 1e-05, %v1619_v30 }
 0x863   :  { %2155 = vrsqrt.f32 %v1621_v32 }
 0x869   :  { %v2154_v33 = vpop.eup %2153 }
 0x86a   :  { %v1624_v34 = vmul.f32 %v2154_v33, %v1608_v1 }
 0x86c   :  { %2043 = vmatprep.mubr.msk.f32.mxu1 %vm35_vm0, %v1624_v34 }
 0x86d   :  { %v2156_v35 = vpop.eup %2155 }
 0x86e   :  { %v1625_v36 = vmul.f32 %v2156_v35, %v1609_v8 }
 0x870   :  { %2044 = vmatmul.mubr.msk.f32.vlgmr.msra.gmra.mrb[20].mxu1 %vm35_vm0, %v1625_v36 }
 0x943   :  { %v2045_v43 = vpop.f32.mrb[20].mxu1 }
 0x944   :  { %v1715_v44 = vadd.f32 %v2045_v43, %v1867_v41  ;;  %v1709_v45 = vpop.f32.mrb[21].mxu1 }
 0x945   :  { %v1710_v46 = vadd.f32 %v1867_v41, %v1709_v45 }
 0x946   :  { %v1719_v48 = vmax.f32 %v1715_v44, 0.0 }
 0x947   :  { %v1718_v47 = vmax.f32 %v1710_v46, 0.0 }
 0x949   :  { %2062 = vmatprep.mubr.msk.f32.mxu0 %vm1735_vm5, %v1718_v47 }
 0x94a   :  { %2063 = vmatmul.mubr.msk.f32.vlgmr.msra.gmra.mrb[16].mxu0 %vm1735_vm5, %v1719_v48 }
 0xa1d   :  { %v2064_v50 = vpop.f32.mrb[16].mxu0 }
 0xa1e   :  { %v1814_v51 = vadd.f32 %v2064_v50, %v1870_v49  ;;  %v1808_v52 = vpop.f32.mrb[17].mxu0 }
 0xa1f   :  { %v1809_v53 = vadd.f32 %v1870_v49, %v1808_v52 }
 0xa20   :  { %v1818_v54 = vadd.f32 %v1814_v51, %v2458_v2 }
 0xa21   :  { %v1817_v55 = vadd.f32 %v1809_v53, %v2461_v39 }
 0xa22   :  { %1820 = vst.msk [vmem:[#allocation2 + $0x8] sm:$0xff] %vm35_vm0, %v1818_v54 }
 0xa23   :  { %1819 = vst.msk [vmem:[#allocation2] sm:$0xff] %vm35_vm0, %v1817_v55 }
 0xa24   :  { %2168 = shalt.err (!%p2165_p4)
}
 0xa25   :  { %s2169_s18 = scalar_lea.hbm %s2541_s9, 256 }
 0xa26   :  { %p2170_p5 = scmp.ne.s32.totalorder %s2541_s9, %s2169_s18  ;;  %p2173_p6 = scmp.lt.u32.totalorder %s2169_s18, %s2541_s9 }
 0xa28   :  { %p2175_p7 = pnand %p2173_p6, %p2170_p5 }
 0xa2a   :  { %2178 = shalt.err (!%p2175_p7)
}
 0xa2b   :  { %s2192_s2 = smov 128  }
 0xa2c   :  { %1832 = dma.vmem_to_hbm [thread:$0]  %s1827_s16, 256, %s2541_s9, [#allocation3], %s2192_s2, %s2192_s2, %s2188_s12  }
 0xa2d   :  { %2179 = dma.done.wait [#allocation3], 256  }
 0xa2e   :  { %2180 = vsyncadd [#allocation3], 4294967040 }
 0xa2f   :  { %1836 = vsyncpa [#allocation3], 1 }

</bundles_post_ra>
